<compile_context>
chip_gen: v7x
topology: tpu7x:2x2x1
jax: 0.10.0
libtpu: 0.0.40
codegen_flags: <defaults>
</compile_context>

<pallas_src>
import functools

import jax
import jax.numpy as jnp
from jax.experimental import pallas as pl
from jax.experimental.pallas import tpu as pltpu


def _round_up(v, m):
    return (v + m - 1) // m * m


def _sublane(dtype):
    # f32 -> 8, bf16 -> 16, int8/fp8 -> 32 (sublane packing factor).
    return max(8, 8 * (4 // jnp.dtype(dtype).itemsize))


def _derive_tile(dim, target, align):
    """Pick a tile (multiple of `align`) near `target` that keeps padding small."""
    dim_a = _round_up(max(int(dim), 1), align)
    target = max(align, min(int(target), dim_a))
    n0 = -(-dim_a // target)
    best_tile, best_total = None, None
    for n in range(n0, n0 + 4):
        tile = _round_up(-(-dim_a // n), align)
        total = _round_up(dim_a, tile)
        if (best_total is None or total < best_total
                or (total == best_total and tile > best_tile)):
            best_tile, best_total = tile, total
    return best_tile


def _vmem_usable_bytes():
    """Generation-aware usable VMEM (v5e/v6e: 128 MiB, v7x: 64 MiB per TC)."""
    cap = 64 << 20  # conservative fallback (v7x per-TC)
    try:
        info = pltpu.get_tpu_info()
        c = int(getattr(info, "vmem_capacity_bytes", 0))
        if c > 0:
            cap = c
    except Exception:
        pass
    return int(cap * 0.8)


def _estimate_vmem(tm, tn, tk, Kp, r, x_isz, w_isz, out_isz):
    buffered = 2 * (tm * tk * x_isz        # x tile (double-buffered)
                    + tk * tn * w_isz      # W^T slab
                    + tn * 4               # bias row (f32)
                    + r * tn * 4           # alpha * B^T (f32)
                    + tm * tn * out_isz)   # output tile
    resident = 2 * Kp * r * w_isz          # resident A^T (constant block index)
    scratch = tm * tn * 4 + tm * r * 4     # f32 accumulator + LoRA mid product
    return buffered + resident + scratch


def _lora_linear_kernel(x_ref, wt_ref, b_ref, at_ref, bt_ref, o_ref,
                        acc_ref, mid_ref, *, tk):
    k = pl.program_id(2)
    nk = pl.num_programs(2)

    x = x_ref[...]                                        # (tm, tk)

    # Dense partial product for this K slab.
    part = jnp.dot(x, wt_ref[...], preferred_element_type=jnp.float32)

    # LoRA mid product against the VMEM-resident A^T, sliced per K slab.
    # Recomputed per (i, j) tile so both M and N grid axes can be "parallel".
    k_off = pl.multiple_of(k * tk, 128)
    a_slab = at_ref[pl.ds(k_off, tk), :]                  # (tk, r)
    mid_part = jnp.dot(x, a_slab, preferred_element_type=jnp.float32)

    # First K step assigns directly (saves a zero-store + read); later steps add.
    @pl.when(k == 0)
    def _():
        acc_ref[...] = part
        mid_ref[...] = mid_part

    @pl.when(k > 0)
    def _():
        acc_ref[...] += part
        mid_ref[...] += mid_part

    # Epilogue: bias + low-rank correction (alpha already folded into B^T, f32).
    @pl.when(k == nk - 1)
    def _():
        lora = jnp.dot(mid_ref[...], bt_ref[...],
                       preferred_element_type=jnp.float32)
        o_ref[...] = (acc_ref[...] + b_ref[...] + lora).astype(o_ref.dtype)


def prepare_lora_params(W, bias, lora_A, lora_B, lora_alpha, *,
                        compute_dtype=jnp.bfloat16,
                        tn_target=1024, tk_target=2048):
    """One-time layout prep: transpose, cast, fold alpha, and PRE-PAD weights.

    W: (out_features, in_features); bias: (out_features,);
    lora_A: (r, in_features); lora_B: (out_features, r).
    Do NOT redo this per forward call.
    """
    # TODO(synk): optional fp8 (v7x) / int8 (v5e/v6e) weight storage with f32 dequant.
    N, K = W.shape
    r = lora_A.shape[0]
    cdt = jnp.dtype(compute_dtype)
    w_isz = cdt.itemsize

    usable = _vmem_usable_bytes()
    # Keep the double-buffered W^T slab inside ~40% of usable VMEM.
    tn_t, tk_t = int(tn_target), int(tk_target)
    while 2 * tn_t * tk_t * w_isz > int(0.4 * usable) and (tn_t > 256 or tk_t > 256):
        if tk_t >= tn_t and tk_t > 256:
            tk_t //= 2
        else:
            tn_t //= 2

    tn = _derive_tile(N, tn_t, 128)
    tk = _derive_tile(K, tk_t, 128)
    Np = _round_up(_round_up(N, 128), tn)
    Kp = _round_up(_round_up(K, 128), tk)

    Wt = W.T.astype(cdt)                                   # (K, N)
    At = lora_A.T.astype(cdt)                              # (K, r)
    # Keep alpha * B^T (and the final low-rank dot) in f32: r-contraction is tiny.
    Bt = lora_B.T.astype(jnp.float32) * jnp.float32(lora_alpha)   # (r, N)
    b2 = bias.reshape(1, -1).astype(jnp.float32)                  # (1, N)

    return {
        "Wt": jnp.pad(Wt, ((0, Kp - K), (0, Np - N))),
        "At": jnp.pad(At, ((0, Kp - K), (0, 0))),
        "Bt": jnp.pad(Bt, ((0, 0), (0, Np - N))),
        "b2": jnp.pad(b2, ((0, 0), (0, Np - N))),
        "N": N, "K": K, "r": r, "tn": tn, "tk": tk, "Np": Np, "Kp": Kp,
        "compute_dtype": cdt, "vmem_usable": usable,
    }


def lora_layer_forward(x, params, *, tm_target=512):
    """out = x @ W^T + bias + (x @ A^T) @ (alpha * B^T)."""
    M, K = x.shape
    assert K == params["K"], "in_features mismatch"
    N, r = params["N"], params["r"]
    tn, tk, Np, Kp = params["tn"], params["tk"], params["Np"], params["Kp"]
    cdt = params["compute_dtype"]
    out_dtype = x.dtype

    if x.dtype != cdt:
        x = x.astype(cdt)

    sub = _sublane(cdt)
    tm = _derive_tile(M, tm_target, sub)

    usable = params["vmem_usable"]
    headroom = 8 << 20
    x_isz = jnp.dtype(cdt).itemsize
    out_isz = jnp.dtype(out_dtype).itemsize
    # Shrink tm (does not affect lane-dense output or the pre-padded weights)
    # until the estimate fits under the generation-aware VMEM budget.
    while (_estimate_vmem(tm, tn, tk, Kp, r, x_isz, x_isz, out_isz) + headroom
           > usable and tm > sub):
        tm = max(sub, _round_up(tm // 2, sub))

    Mp = _round_up(_round_up(M, sub), tm)
    x_p = jnp.pad(x, ((0, Mp - M), (0, Kp - K)))   # only x is padded per call

    grid = (Mp // tm, Np // tn, Kp // tk)
    est = _estimate_vmem(tm, tn, tk, Kp, r, x_isz, x_isz, out_isz)
    vmem_limit = int(min(usable, max(est + headroom, 32 << 20)))

    kernel = functools.partial(_lora_linear_kernel, tk=tk)

    out = pl.pallas_call(
        kernel,
        out_shape=jax.ShapeDtypeStruct((Mp, Np), out_dtype),
        grid_spec=pltpu.PrefetchScalarGridSpec(
            num_scalar_prefetch=0,
            grid=grid,
            in_specs=[
                pl.BlockSpec((tm, tk), lambda i, j, k: (i, k)),    # x tile
                pl.BlockSpec((tk, tn), lambda i, j, k: (k, j)),    # W^T slab
                pl.BlockSpec((1, tn), lambda i, j, k: (0, j)),     # bias row
                pl.BlockSpec((Kp, r), lambda i, j, k: (0, 0)),     # resident A^T
                pl.BlockSpec((r, tn), lambda i, j, k: (0, j)),     # alpha * B^T
            ],
            out_specs=pl.BlockSpec((tm, tn), lambda i, j, k: (i, j)),
            scratch_shapes=[
                pltpu.VMEM((tm, tn), jnp.float32),   # dense-path accumulator
                pltpu.VMEM((tm, r), jnp.float32),    # LoRA mid product
            ],
        ),
        compiler_params=pltpu.CompilerParams(
            # Mid product is recomputed per (i, j) tile, so both M and N axes
            # are megacore-shardable (v7x: 2 TCs). Only the K reduction must
            # stay sequential for the accumulator pattern.
            dimension_semantics=("parallel", "parallel", "arbitrary"),
            vmem_limit_bytes=vmem_limit,
        ),
    )(x_p, params["Wt"], params["b2"], params["At"], params["Bt"])

    return out[:M, :N]


def _reference(x, W, bias, lora_A, lora_B, alpha):
    return x @ W.T + bias + (x @ lora_A.T @ lora_B.T) * alpha


if __name__ == "__main__":
    key = jax.random.PRNGKey(0)

    # ---- test 1: module-sized demo in f32 (batch=8, in=32, out=32, r=4) ----
    k_x, k_w, k_b, k_a, k_lb = jax.random.split(key, 5)
    batch, in_f, out_f, lora_r, lora_alpha = 8, 32, 32, 4, 2.0

    x = jax.random.normal(k_x, (batch, in_f), dtype=jnp.float32)
    W = jax.random.normal(k_w, (out_f, in_f), dtype=jnp.float32) * 0.1
    bias = jax.random.normal(k_b, (out_f,), dtype=jnp.float32) * 0.1
    lora_A = jax.random.normal(k_a, (lora_r, in_f), dtype=jnp.float32) * 0.01
    lora_B = jax.random.normal(k_lb, (out_f, lora_r), dtype=jnp.float32) * 0.01

    ref = _reference(x, W, bias, lora_A, lora_B, lora_alpha)

    p32 = prepare_lora_params(W, bias, lora_A, lora_B, lora_alpha,
                              compute_dtype=jnp.float32)
    out = jax.block_until_ready(lora_layer_forward(x, p32))
    assert jnp.allclose(out, ref, atol=1e-4, rtol=1e-4), "mismatch (test 1, f32)"

    # ---- test 2: multi-tile grid + padding (M/N tiles, K reduction, resident A^T) ----
    key2 = jax.random.PRNGKey(1)
    k_x, k_w, k_b, k_a, k_lb = jax.random.split(key2, 5)
    M2, K2, N2, r2, alpha2 = 48, 200, 300, 6, 0.5

    x2 = jax.random.normal(k_x, (M2, K2), dtype=jnp.float32)
    W2 = jax.random.normal(k_w, (N2, K2), dtype=jnp.float32) * 0.1
    b2_ = jax.random.normal(k_b, (N2,), dtype=jnp.float32) * 0.1
    A2 = jax.random.normal(k_a, (r2, K2), dtype=jnp.float32) * 0.01
    B2 = jax.random.normal(k_lb, (N2, r2), dtype=jnp.float32) * 0.01

    p2 = prepare_lora_params(W2, b2_, A2, B2, alpha2,
                             compute_dtype=jnp.float32,
                             tn_target=128, tk_target=128)
    out2 = jax.block_until_ready(lora_layer_forward(x2, p2, tm_target=16))
    ref2 = _reference(x2, W2, b2_, A2, B2, alpha2)
    assert jnp.allclose(out2, ref2, atol=2e-3, rtol=2e-3), "mismatch (test 2, multi-tile)"

    # ---- test 3: default bf16 operands with f32 accumulation ----
    p16 = prepare_lora_params(W, bias, lora_A, lora_B, lora_alpha)  # bf16 default
    out3 = jax.block_until_ready(lora_layer_forward(x, p16))
    assert out3.dtype == x.dtype
    assert jnp.allclose(out3, ref, atol=3e-2, rtol=3e-2), "mismatch (test 3, bf16)"

    print("KERNEL_OK")
</pallas_src>

<mosaic_0001>
module attributes {stable_mosaic.version = 11 : i64} {
  func.func @_lora_linear_kernel(%arg0: i32, %arg1: i32, %arg2: i32, %arg3: memref<8x128xf32, #tpu.memory_space<vmem>>, %arg4: memref<128x128xf32, #tpu.memory_space<vmem>>, %arg5: memref<1x128xf32, #tpu.memory_space<vmem>>, %arg6: memref<128x4xf32, #tpu.memory_space<vmem>>, %arg7: memref<4x128xf32, #tpu.memory_space<vmem>>, %arg8: memref<8x128xf32, #tpu.memory_space<vmem>>, %arg9: memref<8x128xf32, #tpu.memory_space<vmem>>, %arg10: memref<8x4xf32, #tpu.memory_space<vmem>>) attributes {dimension_semantics = [#tpu.dimension_semantics<parallel>, #tpu.dimension_semantics<parallel>, #tpu.dimension_semantics<arbitrary>], iteration_bounds = array<i64: 1, 1, 1>, scalar_prefetch = 0 : i64, scratch_operands = 2 : i64, tpu.core_type = #tpu.core_type<tc>, window_params = [{transform_indices = @transform_0, window_bounds = array<i64: 8, 128>}, {transform_indices = @transform_1, window_bounds = array<i64: 128, 128>}, {transform_indices = @transform_2, window_bounds = array<i64: 1, 128>}, {pipeline_mode = #tpu.pipeline_mode<synchronous>, transform_indices = @transform_3, window_bounds = array<i64: 128, 4>}, {transform_indices = @transform_4, window_bounds = array<i64: 4, 128>}, {transform_indices = @transform_5, window_bounds = array<i64: 8, 128>}]} {
    %c0 = arith.constant 0 : index
    %c0_0 = arith.constant 0 : index
    %0 = vector.load %arg3[%c0, %c0_0] : memref<8x128xf32, #tpu.memory_space<vmem>>, vector<8x128xf32>
    %c0_1 = arith.constant 0 : index
    %c0_2 = arith.constant 0 : index
    %1 = vector.load %arg4[%c0_1, %c0_2] : memref<128x128xf32, #tpu.memory_space<vmem>>, vector<128x128xf32>
    %cst = arith.constant dense<0.000000e+00> : vector<8x128xf32>
    %2 = tpu.matmul %0, %1, %cst {dimension_numbers = #tpu.dot_dimension_numbers<[1], [0], [0], [1], [0, 0, 1, 1], [], []>} : vector<8x128xf32>, vector<128x128xf32>, vector<8x128xf32> -> vector<8x128xf32>
    %c128_i32 = arith.constant 128 : i32
    %3 = arith.muli %arg2, %c128_i32 : i32
    %4 = tpu.assume_multiple %3, 128 : i32
    %5 = arith.index_cast %4 : i32 to index
    %c0_3 = arith.constant 0 : index
    %6 = vector.load %arg6[%5, %c0_3] : memref<128x4xf32, #tpu.memory_space<vmem>>, vector<128x4xf32>
    %cst_4 = arith.constant dense<0.000000e+00> : vector<8x4xf32>
    %7 = tpu.matmul %0, %6, %cst_4 {dimension_numbers = #tpu.dot_dimension_numbers<[1], [0], [0], [1], [0, 0, 1, 1], [], []>} : vector<8x128xf32>, vector<128x4xf32>, vector<8x4xf32> -> vector<8x4xf32>
    %c0_i32 = arith.constant 0 : i32
    %8 = arith.cmpi eq, %arg2, %c0_i32 : i32
    %9 = arith.extui %8 : i1 to i32
    %c0_i32_5 = arith.constant 0 : i32
    %10 = arith.cmpi ne, %9, %c0_i32_5 : i32
    scf.if %10 {
      %c0_10 = arith.constant 0 : index
      %c0_11 = arith.constant 0 : index
      %17 = vector.load %arg9[%c0_10, %c0_11] : memref<8x128xf32, #tpu.memory_space<vmem>>, vector<8x128xf32>
      tpu.vector_store %arg9[%c0_10, %c0_11], %2 {strides = array<i32>} : memref<8x128xf32, #tpu.memory_space<vmem>>, vector<8x128xf32>,
      %c0_12 = arith.constant 0 : index
      %c0_13 = arith.constant 0 : index
      %18 = vector.load %arg10[%c0_12, %c0_13] : memref<8x4xf32, #tpu.memory_space<vmem>>, vector<8x4xf32>
      tpu.vector_store %arg10[%c0_12, %c0_13], %7 {strides = array<i32>} : memref<8x4xf32, #tpu.memory_space<vmem>>, vector<8x4xf32>,
    } else {
    }
    %c0_i32_6 = arith.constant 0 : i32
    %11 = arith.cmpi sgt, %arg2, %c0_i32_6 : i32
    %12 = arith.extui %11 : i1 to i32
    %c0_i32_7 = arith.constant 0 : i32
    %13 = arith.cmpi ne, %12, %c0_i32_7 : i32
    scf.if %13 {
      %c0_10 = arith.constant 0 : index
      %c0_11 = arith.constant 0 : index
      %17 = vector.load %arg9[%c0_10, %c0_11] : memref<8x128xf32, #tpu.memory_space<vmem>>, vector<8x128xf32>
      %18 = arith.addf %17, %2 : vector<8x128xf32>
      %c0_12 = arith.constant 0 : index
      %c0_13 = arith.constant 0 : index
      %19 = vector.load %arg9[%c0_12, %c0_13] : memref<8x128xf32, #tpu.memory_space<vmem>>, vector<8x128xf32>
      tpu.vector_store %arg9[%c0_12, %c0_13], %18 {strides = array<i32>} : memref<8x128xf32, #tpu.memory_space<vmem>>, vector<8x128xf32>,
      %c0_14 = arith.constant 0 : index
      %c0_15 = arith.constant 0 : index
      %20 = vector.load %arg10[%c0_14, %c0_15] : memref<8x4xf32, #tpu.memory_space<vmem>>, vector<8x4xf32>
      %21 = arith.addf %20, %7 : vector<8x4xf32>
      %c0_16 = arith.constant 0 : index
      %c0_17 = arith.constant 0 : index
      %22 = vector.load %arg10[%c0_16, %c0_17] : memref<8x4xf32, #tpu.memory_space<vmem>>, vector<8x4xf32>
      tpu.vector_store %arg10[%c0_16, %c0_17], %21 {strides = array<i32>} : memref<8x4xf32, #tpu.memory_space<vmem>>, vector<8x4xf32>,
    } else {
    }
    %c0_i32_8 = arith.constant 0 : i32
    %14 = arith.cmpi eq, %arg2, %c0_i32_8 : i32
    %15 = arith.extui %14 : i1 to i32
    %c0_i32_9 = arith.constant 0 : i32
    %16 = arith.cmpi ne, %15, %c0_i32_9 : i32
    scf.if %16 {
      %c0_10 = arith.constant 0 : index
      %c0_11 = arith.constant 0 : index
      %17 = vector.load %arg10[%c0_10, %c0_11] : memref<8x4xf32, #tpu.memory_space<vmem>>, vector<8x4xf32>
      %c0_12 = arith.constant 0 : index
      %c0_13 = arith.constant 0 : index
      %18 = vector.load %arg7[%c0_12, %c0_13] : memref<4x128xf32, #tpu.memory_space<vmem>>, vector<4x128xf32>
      %cst_14 = arith.constant dense<0.000000e+00> : vector<8x128xf32>
      %19 = tpu.matmul %17, %18, %cst_14 {dimension_numbers = #tpu.dot_dimension_numbers<[1], [0], [0], [1], [0, 0, 1, 1], [], []>} : vector<8x4xf32>, vector<4x128xf32>, vector<8x128xf32> -> vector<8x128xf32>
      %c0_15 = arith.constant 0 : index
      %c0_16 = arith.constant 0 : index
      %20 = vector.load %arg9[%c0_15, %c0_16] : memref<8x128xf32, #tpu.memory_space<vmem>>, vector<8x128xf32>
      %c0_17 = arith.constant 0 : index
      %c0_18 = arith.constant 0 : index
      %21 = vector.load %arg5[%c0_17, %c0_18] : memref<1x128xf32, #tpu.memory_space<vmem>>, vector<1x128xf32>
      %22 = vector.broadcast %21 : vector<1x128xf32> to vector<8x128xf32>
      %23 = arith.addf %20, %22 : vector<8x128xf32>
      %24 = arith.addf %23, %19 : vector<8x128xf32>
      %c0_19 = arith.constant 0 : index
      %c0_20 = arith.constant 0 : index
      %25 = vector.load %arg8[%c0_19, %c0_20] : memref<8x128xf32, #tpu.memory_space<vmem>>, vector<8x128xf32>
      tpu.vector_store %arg8[%c0_19, %c0_20], %24 {strides = array<i32>} : memref<8x128xf32, #tpu.memory_space<vmem>>, vector<8x128xf32>,
    } else {
    }
    return
  }
  func.func @transform_0(%arg0: i32, %arg1: i32, %arg2: i32) -> (i32, i32) {
    %c0_i32 = arith.constant 0 : i32
    return %arg0, %arg2 : i32, i32
  }
  func.func @transform_1(%arg0: i32, %arg1: i32, %arg2: i32) -> (i32, i32) {
    %c0_i32 = arith.constant 0 : i32
    return %arg2, %arg1 : i32, i32
  }
  func.func @transform_2(%arg0: i32, %arg1: i32, %arg2: i32) -> (i32, i32) {
    %c0_i32 = arith.constant 0 : i32
    %c0_i32_0 = arith.constant 0 : i32
    return %c0_i32, %arg1 : i32, i32
  }
  func.func @transform_3(%arg0: i32, %arg1: i32, %arg2: i32) -> (i32, i32) {
    %c0_i32 = arith.constant 0 : i32
    %c0_i32_0 = arith.constant 0 : i32
    %c0_i32_1 = arith.constant 0 : i32
    return %c0_i32, %c0_i32_0 : i32, i32
  }
  func.func @transform_4(%arg0: i32, %arg1: i32, %arg2: i32) -> (i32, i32) {
    %c0_i32 = arith.constant 0 : i32
    %c0_i32_0 = arith.constant 0 : i32
    return %c0_i32, %arg1 : i32, i32
  }
  func.func @transform_5(%arg0: i32, %arg1: i32, %arg2: i32) -> (i32, i32) {
    %c0_i32 = arith.constant 0 : i32
    return %arg0, %arg1 : i32, i32
  }
}

</mosaic_0001>

<bundles_post_ra>
// kernel: tpu_custom_call.1
= control target key start
LH: loop header
LB: loop body
LE: loop exit
PB: predicated region body
PF: predicated region fallthrough
CT: control target
= control target key end

     0   :  { %10 = vsyncpa [#allocation5], 0  ;;  %s737_s0 = inlined_call_operand.hbm [shape: f32[8,128], index: 0, kind: input, shape index: {}]   ;;  %s738_s1 = inlined_call_operand.vmem [shape: f32[128,128], index: 1, kind: input, shape index: {}]   ;;  %s739_s2 = inlined_call_operand.vmem [shape: f32[1,128], index: 2, kind: input, shape index: {}]   ;;  %s740_s3 = inlined_call_operand.vmem [shape: f32[128,4], index: 3, kind: input, shape index: {}]   ;;  %s741_s4 = inlined_call_operand.vmem [shape: f32[4,128], index: 4, kind: input, shape index: {}]   ;;  %s742_s5 = inlined_call_operand.hbm [shape: f32[8,128], index: 5, kind: output, shape index: {}]  }
   0x1   :  { %11 = vsyncpa [#allocation6], 0  ;;  %s553_s18 = smov [#allocation4]   ;;  %s505_s22 = scalar_lea.hbm %s737_s0, 128 }
   0x2   :  { %s18_s19 = sshll.u32 %s553_s18, 4  ;;  %p506_p0 = scmp.ne.s32.totalorder %s737_s0, %s505_s22  ;;  %s19_s19 = int_to_ptr.vmem [resolvable:$true] %s18_s19 }
   0x3   :  { %p509_p1 = scmp.lt.u32.totalorder %s505_s22, %s737_s0 }
   0x5   :  { %p511_p2 = pnand %p509_p1, %p506_p0 }
   0x7   :  { %514 = shalt.err (!%p511_p2)
}
   0x8   :  { %s515_s27 = scalar_lea.vmem %s19_s19, 128  ;;  %p520_p4 = scmp.lt.s32.totalorder %s19_s19, %s19_s19 }
   0x9   :  { %p516_p3 = scmp.ne.s32.totalorder %s19_s19, %s515_s27  ;;  %p521_p5 = scmp.lt.s32.totalorder %s515_s27, %s515_s27 }
   0xb   :  { %p522_p6 = por %p521_p5, %p520_p4 }
   0xd   :  { %p523_p7 = pnand %p522_p6, %p516_p3 }
   0xf   :  { %526 = shalt.err (!%p523_p7)
}
  0x10   :  { %21 = dma.hbm_to_vmem [thread:$0]  %s737_s0, 128, %s19_s19, [#allocation5]  }
  0x11   :  { %549 = dma.done.wait [#allocation5], 128  }
  0x12   :  { %550 = vsyncadd [#allocation5], 4294967168  ;;  %v554_v0 = vmov 0.0|0.0   ;;  %vm555_vm0 = vmmov 0   ;;  %v556_v1 = vmov 0.0   ;;  %v122_v2 = vld [vmem:[%s740_s3] sm:$0xff] }
  0x13   :  { %473 = vmatprep.subr.bf16.mxu1 %v554_v0  ;;  %441 = vmatprep.mubr.msk.f32.mxu1 %vm555_vm0, %v556_v1  ;;  %v123_v3 = vld [vmem:[%s740_s3 + $0x8] sm:$0xff]  ;;  %v124_v4 = vld [vmem:[%s740_s3 + $0x10] sm:$0xff]  ;;  %v125_v6 = vld [vmem:[%s740_s3 + $0x18] sm:$0xff]  ;;  %vm235_vm1 = vcmask 1043456   ;;  %vm213_vm2 = vcmask 31744   ;;  %s557_s18 = smov [#allocation7]  }
  0x14   :  { %449 = vmatprep.subr.bf16.mxu0 %v554_v0  ;;  %406 = vmatprep.mubr.msk.f32.mxu0 %vm555_vm0, %v556_v1  ;;  %v474_v5 = vpack.c.bf16 %v123_v3, %v122_v2  ;;  %v477_v7 = vpack.c.bf16 %v125_v6, %v124_v4  ;;  %v126_v8 = vld [vmem:[%s740_s3 + $0x20] sm:$0xff]  ;;  %v127_v9 = vld [vmem:[%s740_s3 + $0x28] sm:$0xff]  ;;  %v36_v12 = vld [vmem:[%s738_s1 + $0x10] sm:$0xff]  ;;  %s326_s19 = sshll.u32 %s557_s18, 4  ;;  %s327_s19 = int_to_ptr.vmem [resolvable:$true] %s326_s19 }
  0x15   :  { %v34_v10 = vld [vmem:[%s738_s1] sm:$0xff]  ;;  %v35_v11 = vld [vmem:[%s738_s1 + $0x8] sm:$0xff]  ;;  %v37_v13 = vld [vmem:[%s738_s1 + $0x18] sm:$0xff]  ;;  %v480_v14 = vpack.c.bf16 %v127_v9, %v126_v8  ;;  %p532_p9 = scmp.lt.s32.totalorder %s327_s19, %s327_s19 }
  0x16   :  { %475 = vmatpush3.bf16.msra.mxu1 %v474_v5  ;;  %v450_v15 = vpack.c.bf16 %v35_v11, %v34_v10  ;;  %v128_v16 = vld [vmem:[%s740_s3 + $0x30] sm:$0xff]  ;;  %v129_v17 = vld [vmem:[%s740_s3 + $0x38] sm:$0xff]  ;;  %v453_v18 = vpack.c.bf16 %v37_v13, %v36_v12  ;;  %v38_v19 = vld [vmem:[%s738_s1 + $0x20] sm:$0xff] }
  0x17   :  { %476 = vmatprep.subr.bf16.mxu1 %v554_v0  ;;  %v39_v20 = vld [vmem:[%s738_s1 + $0x28] sm:$0xff]  ;;  %v483_v21 = vpack.c.bf16 %v129_v17, %v128_v16  ;;  %v130_v22 = vld [vmem:[%s740_s3 + $0x40] sm:$0xff]  ;;  %v40_v25 = vld [vmem:[%s738_s1 + $0x30] sm:$0xff] }
  0x18   :  { %451 = vmatpush3.bf16.msra.mxu0 %v450_v15  ;;  %v131_v23 = vld [vmem:[%s740_s3 + $0x48] sm:$0xff]  ;;  %v456_v24 = vpack.c.bf16 %v39_v20, %v38_v19  ;;  %v41_v26 = vld [vmem:[%s738_s1 + $0x38] sm:$0xff]  ;;  %v132_v28 = vld [vmem:[%s740_s3 + $0x50] sm:$0xff] }
  0x19   :  { %452 = vmatprep.subr.bf16.mxu0 %v554_v0  ;;  %v486_v27 = vpack.c.bf16 %v131_v23, %v130_v22  ;;  %v133_v29 = vld [vmem:[%s740_s3 + $0x58] sm:$0xff]  ;;  %v459_v30 = vpack.c.bf16 %v41_v26, %v40_v25  ;;  %v42_v31 = vld [vmem:[%s738_s1 + $0x40] sm:$0xff]  ;;  %v43_v32 = vld [vmem:[%s738_s1 + $0x48] sm:$0xff] }
  0x1a   :  { %478 = vmatpush3.bf16.msra.mxu1 %v477_v7  ;;  %v489_v33 = vpack.c.bf16 %v133_v29, %v132_v28  ;;  %v134_v34 = vld [vmem:[%s740_s3 + $0x60] sm:$0xff]  ;;  %v135_v35 = vld [vmem:[%s740_s3 + $0x68] sm:$0xff]  ;;  %v462_v36 = vpack.c.bf16 %v43_v32, %v42_v31  ;;  %v44_v37 = vld [vmem:[%s738_s1 + $0x50] sm:$0xff] }
  0x1b   :  { %479 = vmatprep.subr.bf16.mxu1 %v554_v0  ;;  %v45_v38 = vld [vmem:[%s738_s1 + $0x58] sm:$0xff]  ;;  %v492_v39 = vpack.c.bf16 %v135_v35, %v134_v34  ;;  %v136_v40 = vld [vmem:[%s740_s3 + $0x70] sm:$0xff]  ;;  %v46_v43 = vld [vmem:[%s738_s1 + $0x60] sm:$0xff] }
  0x1c   :  { %454 = vmatpush3.bf16.msra.mxu0 %v453_v18  ;;  %v137_v41 = vld [vmem:[%s740_s3 + $0x78] sm:$0xff]  ;;  %v465_v42 = vpack.c.bf16 %v45_v38, %v44_v37  ;;  %v47_v44 = vld [vmem:[%s738_s1 + $0x68] sm:$0xff]  ;;  %v48_v47 = vld [vmem:[%s738_s1 + $0x70] sm:$0xff] }
  0x1d   :  { %455 = vmatprep.subr.bf16.mxu0 %v554_v0  ;;  %v495_v45 = vpack.c.bf16 %v137_v41, %v136_v40  ;;  %v468_v46 = vpack.c.bf16 %v47_v44, %v46_v43  ;;  %v49_v48 = vld [vmem:[%s738_s1 + $0x78] sm:$0xff]  ;;  %v33_v49 = vld [vmem:[#allocation4] sm:$0xff]  ;;  %v230_v51 = vld [vmem:[%s741_s4] sm:$0xf]  ;;  %s527_s4 = scalar_lea.vmem %s327_s19, 128 }
  0x1e   :  { %481 = vmatpush3.bf16.msra.mxu1 %v480_v14  ;;  %v471_v50 = vpack.c.bf16 %v49_v48, %v48_v47  ;;  %v337_v55 = vld [vmem:[%s739_s2] ss:$0 sm:$0xff]  ;;  %p528_p8 = scmp.ne.s32.totalorder %s327_s19, %s527_s4  ;;  %p533_p10 = scmp.lt.s32.totalorder %s527_s4, %s527_s4 }
  0x1f   :  { %482 = vmatprep.subr.bf16.mxu1 %v554_v0 }
  0x20   :  { %457 = vmatpush3.bf16.msra.mxu0 %v456_v24  ;;  %p534_p11 = por %p533_p10, %p532_p9 }
  0x21   :  { %458 = vmatprep.subr.bf16.mxu0 %v554_v0 }
  0x22   :  { %484 = vmatpush3.bf16.msra.mxu1 %v483_v21  ;;  %p535_p12 = pnand %p534_p11, %p528_p8 }
  0x23   :  { %485 = vmatprep.subr.bf16.mxu1 %v554_v0 }
  0x24   :  { %460 = vmatpush3.bf16.msra.mxu0 %v459_v30 }
  0x25   :  { %461 = vmatprep.subr.bf16.mxu0 %v554_v0 }
  0x26   :  { %487 = vmatpush3.bf16.msra.mxu1 %v486_v27 }
  0x27   :  { %488 = vmatprep.subr.bf16.mxu1 %v554_v0 }
  0x28   :  { %463 = vmatpush3.bf16.msra.mxu0 %v462_v36 }
  0x29   :  { %464 = vmatprep.subr.bf16.mxu0 %v554_v0 }
  0x2a   :  { %490 = vmatpush3.bf16.msra.mxu1 %v489_v33 }
  0x2b   :  { %491 = vmatprep.subr.bf16.mxu1 %v554_v0 }
  0x2c   :  { %466 = vmatpush3.bf16.msra.mxu0 %v465_v42 }
  0x2d   :  { %467 = vmatprep.subr.bf16.mxu0 %v554_v0 }
  0x2e   :  { %493 = vmatpush3.bf16.msra.mxu1 %v492_v39 }
  0x2f   :  { %494 = vmatprep.subr.bf16.mxu1 %v554_v0 }
  0x30   :  { %469 = vmatpush3.bf16.msra.mxu0 %v468_v46 }
  0x31   :  { %470 = vmatprep.subr.bf16.mxu0 %v554_v0 }
  0x32   :  { %496 = vmatpush3.bf16.msra.mxu1 %v495_v45 }
  0x34   :  { %472 = vmatpush3.bf16.msra.mxu0 %v471_v50 }
  0x35   :  { %442 = vmatmul.mubr.f32.vlgmr.msra.gmra.mrb[0].mxu1 %v33_v49  ;;  %444 = vmatprep.subr.mxu0 %v556_v1 }
  0x37   :  { %407 = vmatmul.mubr.f32.vlgmr.msra.gmra.mrb[0].mxu0 %v33_v49 }
  0x38   :  { %446 = vmatprep.mubr.msk.f32.mxu0 %vm555_vm0, %v556_v1  ;;  %445 = vmatpush3.msk.msra.mxu0 %vm235_vm1, %v230_v51 }
 0x108   :  { %v204_v52 = vpop.f32.mrb[0].mxu1 }
 0x109   :  { %214 = vst.msk [vmem:[#allocation3] sm:$0xff] %vm213_vm2, %v204_v52  ;;  %v443_v53 = vpop.f32.mrb[1].mxu1 }
 0x110   :  { %v229_v54 = vld [vmem:[#allocation3] sm:$0xff] }
 0x111   :  { %447 = vmatmul.mubr.msk.f32.vlgmr.msra.gmra.mrb[0].mxu0 %vm213_vm2, %v229_v54 }
 0x1e4   :  { %v305_v56 = vpop.f32.mrb[0].mxu0 }
 0x1e5   :  { %v497_v57 = vadd.f32 %v337_v55, %v305_v56  ;;  %v448_v58 = vpop.f32.mrb[1].mxu0 }
 0x1e7   :  { %319 = vst [vmem:[#allocation7] sm:$0xff] %v497_v57 }
 0x1e8   :  { %538 = shalt.err (!%p535_p12)
}
 0x1e9   :  { %s539_s22 = scalar_lea.hbm %s742_s5, 128 }
 0x1ea   :  { %p540_p13 = scmp.ne.s32.totalorder %s742_s5, %s539_s22  ;;  %p543_p0 = scmp.lt.u32.totalorder %s539_s22, %s742_s5 }
 0x1ec   :  { %p545_p1 = pnand %p543_p0, %p540_p13 }
 0x1ee   :  { %548 = shalt.err (!%p545_p1)
}
 0x1ef   :  { %329 = dma.vmem_to_hbm [thread:$0]  %s327_s19, 128, %s742_s5, [#allocation6]  }
 0x1f0   :  { %551 = dma.done.wait [#allocation6], 128  }
 0x1f1   :  { %552 = vsyncadd [#allocation6], 4294967168 }
 0x1f2   :  { %333 = vsyncpa [#allocation5], 1 }
 0x1f3   :  { %334 = vsyncpa [#allocation6], 1 }

</bundles_post_ra>
